<compile_context>
chip_gen: v6e
topology: v6e:2x2x1
jax: 0.10.0
libtpu: 0.0.40
codegen_flags: <defaults>
</compile_context>

<pallas_src>
import jax
import jax.numpy as jnp
import numpy as np
from jax.experimental import pallas as pl
from jax.experimental.pallas import tpu as pltpu

N_V = 2   # number of vertical conv filters   (self.n_v)
N_H = 4   # number of horizontal conv filters (self.n_h)

_NEG = -1e30  # additive mask value for invalid pooling positions (finite)


def caser_kernel(seqs_ref, pos_ref, neg_ref,          # (bb, L*D) bf16 streams
                 wh_big_ref,                           # (L*D, L*L*n_h) bf16
                 mask_ref,                             # (1, L*L*n_h) f32 0/-1e30
                 bh_ref,                               # (1, L*n_h) f32
                 wv_rep_ref,                           # (L*D, L*D) bf16
                 wfh_blk_ref,                          # (L*n_h, L*D) bf16
                 b2_ref,                               # (1, L*D) f32
                 s_ref,                                # (L*D, L) f32 block-sum
                 pos_out_ref, neg_out_ref):            # (bb, L) f32
    bb = seqs_ref.shape[0]
    L = pos_out_ref.shape[1]
    Lnh = bh_ref.shape[1]                              # L * n_h

    x16 = seqs_ref[...]                                # (bb, L*D) bf16

    # ---- all horizontal convs (every filter size, every position): 1 matmul
    conv = jnp.dot(x16, wh_big_ref[...],
                   preferred_element_type=jnp.float32)  # (bb, L*L*n_h) f32
    # precomputed additive mask kills (position, size) pairs whose filter
    # would run off the end of the sequence (no iota / divide / select).
    conv = conv + mask_ref[...]

    # max over positions; conv bias + relu applied AFTER the max (both
    # monotone, so max_t relu(x_t + b) == relu(max_t x_t + b)).
    pooled = jnp.max(conv.reshape(bb, L, Lnh), axis=1)   # (bb, L*n_h)
    pooled = jnp.maximum(pooled + bh_ref[...], 0.0)

    # ---- fc_h (block-diagonal, all positions at once) + vertical branch
    # (conv_v ∘ fc_v folded host-side, replicated per output position) ->
    # flat lane-dense (bb, L*D) log_feats.  No relayout, no broadcast.
    log_feats = (jnp.dot(x16, wv_rep_ref[...],
                         preferred_element_type=jnp.float32)
                 + jnp.dot(pooled.astype(jnp.bfloat16), wfh_blk_ref[...],
                           preferred_element_type=jnp.float32)
                 + b2_ref[...])                          # (bb, L*D) f32

    # ---- logits: flat elementwise product, then a constant 0/1 block-sum
    # matrix on the MXU reduces each D-chunk -> (bb, L).
    posf = pos_ref[...].astype(jnp.float32)
    negf = neg_ref[...].astype(jnp.float32)
    s = s_ref[...]
    pos_out_ref[...] = jnp.dot(log_feats * posf, s,
                               preferred_element_type=jnp.float32)
    neg_out_ref[...] = jnp.dot(log_feats * negf, s,
                               preferred_element_type=jnp.float32)


def pack_caser_params(wv, bv, wh_list, bh, wfv, bfv, wfh, bfh, *,
                      emb_scale=1.0, compute_dtype=jnp.bfloat16):
    """One-time host-side repack of the PyTorch weights into lane-dense
    matmul operands (done once per model, not per call).  `emb_scale` folds
    the sqrt(D) embedding scaling of log2feats into the weights that consume
    the sequence embeddings."""
    n_v, L = np.asarray(wv).shape
    D, n_h = np.asarray(wfh).shape
    assert len(wh_list) == L
    # Invariant required by the -1e30 masking: every filter size must have at
    # least one valid pooling position (t = 0 always is).
    for fi in range(1, L + 1):
        assert L - fi + 1 >= 1, "filter size larger than sequence length"

    scale = float(emb_scale)

    # -- horizontal conv bank -> one zero-padded im2col-style weight ---------
    # wh_big[s*D + d, t*(L*n_h) + (fi-1)*n_h + c] = scale * W_fi[c, s - t, d]
    wh_big = np.zeros((L * D, L * L * n_h), np.float32)
    mask = np.full((1, L * L * n_h), _NEG, np.float32)
    for fi in range(1, L + 1):                  # filter size
        W = np.asarray(wh_list[fi - 1], np.float32)       # (n_h, fi, D)
        for t in range(L - fi + 1):             # valid output positions
            col0 = t * (L * n_h) + (fi - 1) * n_h
            mask[0, col0:col0 + n_h] = 0.0
            for j in range(fi):
                src = t + j
                wh_big[src * D:(src + 1) * D, col0:col0 + n_h] = \
                    scale * W[:, j, :].T

    # -- fc_h as a block-diagonal matrix (independent per position) ----------
    wfh_blk = np.zeros((L * n_h, L * D), np.float32)
    wfh_t = np.asarray(wfh, np.float32).T       # (n_h, D)
    for ii in range(L):
        wfh_blk[ii * n_h:(ii + 1) * n_h, ii * D:(ii + 1) * D] = wfh_t

    # -- vertical conv folded with fc_v (linear chain), replicated per pos ---
    wfv_r = np.asarray(wfv, np.float32).reshape(D, n_v, D)        # [e, c, d]
    wv_eff = scale * np.einsum("cl,ecd->lde", np.asarray(wv, np.float32),
                               wfv_r).reshape(L * D, D)
    bv_eff = (np.asarray(bfv, np.float32)
              + np.einsum("c,ecd->e", np.asarray(bv, np.float32), wfv_r))
    wv_rep = np.tile(wv_eff, (1, L))                              # (L*D, L*D)

    # combined per-position bias: bfh + bv_eff, same for every position
    b2 = np.tile(np.asarray(bfh, np.float32) + bv_eff, L).reshape(1, L * D)

    # 0/1 block-sum matrix: sums each D-chunk of a flat (.., L*D) row
    s_blk = np.zeros((L * D, L), np.float32)
    for l in range(L):
        s_blk[l * D:(l + 1) * D, l] = 1.0

    return dict(
        wh_big=jnp.asarray(wh_big, compute_dtype),
        mask=jnp.asarray(mask, jnp.float32),
        bh_flat=jnp.asarray(np.asarray(bh, np.float32).reshape(1, L * n_h)),
        wv_rep=jnp.asarray(wv_rep, compute_dtype),
        wfh_blk=jnp.asarray(wfh_blk, compute_dtype),
        b2=jnp.asarray(b2, jnp.float32),
        s_blk=jnp.asarray(s_blk, jnp.float32),
    )


def _pick_block_b(batch, requested):
    """Largest multiple-of-8 divisor of `batch` that is <= min(requested,
    batch//2) -- capping at batch//2 keeps the 1-D grid >= 2 steps so a v7x
    megacore can shard it across both TensorCores.  Falls back to the full
    batch (block == full array dim is always a legal BlockSpec), so no
    padding / concatenate is ever needed."""
    cap = min(requested, max(8, batch // 2))
    best = None
    for d in range(8, batch + 1, 8):
        if batch % d == 0 and d <= cap:
            best = d
    return best if best is not None else batch


def caser_forward(seqs, pos_embs, neg_embs, params, *, block_b=256):
    """seqs: raw (unscaled) item embeddings for log_seqs, (B, L, D).
    pos_embs / neg_embs: item embeddings for pos/neg targets, (B, L, D)."""
    B, L, D = pos_embs.shape
    Lnh = params["bh_flat"].shape[1]               # L * n_h

    # bf16 streaming activations (kernel is HBM-bound on v5e/v6e/v7x, so
    # halving the bytes of the three streams is the big lever).  In production
    # keep the item-embedding table in bf16 so the gather already emits bf16
    # and these casts are no-ops.  The (B,L,D)->(B,L*D) reshape is a free
    # row-major view; there is no padding or concatenation.
    seqs_flat = seqs.reshape(B, L * D).astype(jnp.bfloat16)
    pos_flat = pos_embs.reshape(B, L * D).astype(jnp.bfloat16)
    neg_flat = neg_embs.reshape(B, L * D).astype(jnp.bfloat16)

    bb = _pick_block_b(B, block_b)
    grid = (B // bb,)

    rep = lambda b: (0, 0)        # resident constants: DMA'd once (index fixed)
    stream = lambda b: (b, 0)     # batch-tiled streams / outputs

    # NOTE: the review's "(L, B) lane-dense outputs" is intentionally not
    # applied -- the (bb, L) output block spans the full minor dim (contiguous
    # writeback DMA) and output bytes are ~2% of the streamed input bytes;
    # batch-into-lanes would need extra transpose passes that cost more than
    # the masked stores they remove.
    pos_l, neg_l = pl.pallas_call(
        caser_kernel,
        out_shape=(jax.ShapeDtypeStruct((B, L), jnp.float32),
                   jax.ShapeDtypeStruct((B, L), jnp.float32)),
        grid=grid,
        in_specs=[
            pl.BlockSpec((bb, L * D), stream),         # seqs
            pl.BlockSpec((bb, L * D), stream),         # pos
            pl.BlockSpec((bb, L * D), stream),         # neg
            pl.BlockSpec((L * D, L * Lnh), rep),       # wh_big
            pl.BlockSpec((1, L * Lnh), rep),           # mask
            pl.BlockSpec((1, Lnh), rep),               # bh_flat
            pl.BlockSpec((L * D, L * D), rep),         # wv_rep
            pl.BlockSpec((Lnh, L * D), rep),           # wfh_blk
            pl.BlockSpec((1, L * D), rep),             # b2
            pl.BlockSpec((L * D, L), rep),             # s_blk
        ],
        out_specs=(pl.BlockSpec((bb, L), stream),
                   pl.BlockSpec((bb, L), stream)),
        compiler_params=pltpu.CompilerParams(
            dimension_semantics=("parallel",)),        # v7x: both TensorCores
    )(seqs_flat, pos_flat, neg_flat,
      params["wh_big"], params["mask"], params["bh_flat"],
      params["wv_rep"], params["wfh_blk"], params["b2"], params["s_blk"])
    return pos_l, neg_l


def reference_forward(seqs, pos_embs, neg_embs, wv, bv, wh_list, bh, wfv, bfv,
                      wfh, bfh):
    """Pure-JAX mirror of the PyTorch forward (expects already-scaled seqs)."""
    B, L, D = seqs.shape
    out_v = jnp.einsum("cl,bld->bcd", wv, seqs) + bv[None, :, None]
    out_v = out_v.reshape(B, -1)
    temp_v = out_v @ wfv.T + bfv                       # (B, D)
    pools = []
    for i in range(1, L + 1):
        W = wh_list[i - 1]                             # (n_h, i, D)
        T = L - i + 1
        conv = jnp.stack(
            [jnp.einsum("bjd,cjd->bc", seqs[:, t:t + i, :], W)
             for t in range(T)], axis=2)               # (B, n_h, T)
        conv = jax.nn.relu(conv + bh[i - 1][None, :, None])
        pools.append(jnp.max(conv, axis=2))            # (B, n_h)
    out_h = jnp.stack(pools, axis=1)                   # (B, L, n_h)
    temp_h = jnp.einsum("blc,dc->bld", out_h, wfh) + bfh
    log_feats = temp_h + temp_v[:, None, :]
    return ((log_feats * pos_embs).sum(-1), (log_feats * neg_embs).sum(-1))


if __name__ == "__main__":
    B, L, D = 16, 8, 32
    num_items = 100
    n_v, n_h = N_V, N_H

    keys = jax.random.split(jax.random.PRNGKey(0), 20)
    emb = jax.random.normal(keys[0], (num_items + 1, D), jnp.float32) * 0.1
    wv = jax.random.normal(keys[1], (n_v, L), jnp.float32) * 0.1
    bv = jax.random.normal(keys[2], (n_v,), jnp.float32) * 0.1
    wh_list = [jax.random.normal(keys[3 + i], (n_h, i + 1, D), jnp.float32) * 0.1
               for i in range(L)]
    bh = jax.random.normal(keys[11], (L, n_h), jnp.float32) * 0.1
    wfv = jax.random.normal(keys[12], (D, n_v * D), jnp.float32) * 0.1
    bfv = jax.random.normal(keys[13], (D,), jnp.float32) * 0.1
    wfh = jax.random.normal(keys[14], (D, n_h), jnp.float32) * 0.1
    bfh = jax.random.normal(keys[15], (D,), jnp.float32) * 0.1

    # sqrt(D) embedding scaling folded into the packed weights (review item 7)
    params = pack_caser_params(wv, bv, wh_list, bh, wfv, bfv, wfh, bfh,
                               emb_scale=D ** 0.5)

    # Item indices and embedding lookups (glue, plain JAX).
    log_seqs = jax.random.randint(keys[16], (B, L), 1, num_items + 1)
    pos_seqs = jax.random.randint(keys[17], (B, L), 1, num_items + 1)
    neg_seqs = jax.random.randint(keys[18], (B, L), 1, num_items + 1)

    seqs_raw = emb[log_seqs]          # raw gather; scaling lives in the weights
    pos_embs = emb[pos_seqs]
    neg_embs = emb[neg_seqs]

    pos_logits, neg_logits = caser_forward(seqs_raw, pos_embs, neg_embs, params)
    jax.block_until_ready((pos_logits, neg_logits))

    ref_pos, ref_neg = reference_forward(seqs_raw * (D ** 0.5), pos_embs,
                                         neg_embs, wv, bv, wh_list, bh,
                                         wfv, bfv, wfh, bfh)
    # tolerance sized for bf16 streaming activations + bf16 MXU weights with
    # fp32 accumulation
    np.testing.assert_allclose(np.asarray(pos_logits), np.asarray(ref_pos),
                               rtol=2e-2, atol=2e-2)
    np.testing.assert_allclose(np.asarray(neg_logits), np.asarray(ref_neg),
                               rtol=2e-2, atol=2e-2)

    # TODO(synk): dropout (self.drop_ratio) is declared in __init__ but never
    # applied in the PyTorch forward, so it is intentionally omitted here.
    print("KERNEL_OK")
</pallas_src>

<mosaic_0001>
module attributes {stable_mosaic.version = 11 : i64} {
  func.func @caser_kernel(%arg0: i32, %arg1: memref<8x256xbf16, #tpu.memory_space<vmem>>, %arg2: memref<8x256xbf16, #tpu.memory_space<vmem>>, %arg3: memref<8x256xbf16, #tpu.memory_space<vmem>>, %arg4: memref<256x256xbf16, #tpu.memory_space<vmem>>, %arg5: memref<1x256xf32, #tpu.memory_space<vmem>>, %arg6: memref<1x32xf32, #tpu.memory_space<vmem>>, %arg7: memref<256x256xbf16, #tpu.memory_space<vmem>>, %arg8: memref<32x256xbf16, #tpu.memory_space<vmem>>, %arg9: memref<1x256xf32, #tpu.memory_space<vmem>>, %arg10: memref<256x8xf32, #tpu.memory_space<vmem>>, %arg11: memref<8x8xf32, #tpu.memory_space<vmem>>, %arg12: memref<8x8xf32, #tpu.memory_space<vmem>>) attributes {dimension_semantics = [#tpu.dimension_semantics<parallel>], iteration_bounds = array<i64: 2>, scalar_prefetch = 0 : i64, scratch_operands = 0 : i64, tpu.core_type = #tpu.core_type<tc>, window_params = [{transform_indices = @transform_0, window_bounds = array<i64: 8, 256>}, {transform_indices = @transform_1, window_bounds = array<i64: 8, 256>}, {transform_indices = @transform_2, window_bounds = array<i64: 8, 256>}, {pipeline_mode = #tpu.pipeline_mode<synchronous>, transform_indices = @transform_3, window_bounds = array<i64: 256, 256>}, {pipeline_mode = #tpu.pipeline_mode<synchronous>, transform_indices = @transform_4, window_bounds = array<i64: 1, 256>}, {pipeline_mode = #tpu.pipeline_mode<synchronous>, transform_indices = @transform_5, window_bounds = array<i64: 1, 32>}, {pipeline_mode = #tpu.pipeline_mode<synchronous>, transform_indices = @transform_6, window_bounds = array<i64: 256, 256>}, {pipeline_mode = #tpu.pipeline_mode<synchronous>, transform_indices = @transform_7, window_bounds = array<i64: 32, 256>}, {pipeline_mode = #tpu.pipeline_mode<synchronous>, transform_indices = @transform_8, window_bounds = array<i64: 1, 256>}, {pipeline_mode = #tpu.pipeline_mode<synchronous>, transform_indices = @transform_9, window_bounds = array<i64: 256, 8>}, {transform_indices = @transform_10, window_bounds = array<i64: 8, 8>}, {transform_indices = @transform_11, window_bounds = array<i64: 8, 8>}]} {
    %c0 = arith.constant 0 : index
    %c0_0 = arith.constant 0 : index
    %0 = vector.load %arg1[%c0, %c0_0] : memref<8x256xbf16, #tpu.memory_space<vmem>>, vector<8x256xbf16>
    %c0_1 = arith.constant 0 : index
    %c0_2 = arith.constant 0 : index
    %1 = vector.load %arg4[%c0_1, %c0_2] : memref<256x256xbf16, #tpu.memory_space<vmem>>, vector<256x256xbf16>
    %cst = arith.constant dense<0.000000e+00> : vector<8x256xf32>
    %2 = tpu.matmul %0, %1, %cst {dimension_numbers = #tpu.dot_dimension_numbers<[1], [0], [0], [1], [0, 0, 1, 1], [], []>} : vector<8x256xbf16>, vector<256x256xbf16>, vector<8x256xf32> -> vector<8x256xf32>
    %c0_3 = arith.constant 0 : index
    %c0_4 = arith.constant 0 : index
    %3 = vector.load %arg5[%c0_3, %c0_4] : memref<1x256xf32, #tpu.memory_space<vmem>>, vector<1x256xf32>
    %4 = vector.broadcast %3 : vector<1x256xf32> to vector<8x256xf32>
    %5 = arith.addf %2, %4 : vector<8x256xf32>
    %6 = vector.shape_cast %5 : vector<8x256xf32> to vector<8x8x32xf32>
    %cst_5 = arith.constant dense<0xFF800000> : vector<8x32xf32>
    %7 = vector.multi_reduction <maximumf>, %6, %cst_5 [1] : vector<8x8x32xf32> to vector<8x32xf32>
    %c0_6 = arith.constant 0 : index
    %c0_7 = arith.constant 0 : index
    %8 = vector.load %arg6[%c0_6, %c0_7] : memref<1x32xf32, #tpu.memory_space<vmem>>, vector<1x32xf32>
    %9 = vector.broadcast %8 : vector<1x32xf32> to vector<8x32xf32>
    %10 = arith.addf %7, %9 : vector<8x32xf32>
    %cst_8 = arith.constant 0.000000e+00 : f32
    %11 = vector.broadcast %cst_8 : f32 to vector<8x32xf32>
    %12 = arith.maximumf %10, %11 : vector<8x32xf32>
    %c0_9 = arith.constant 0 : index
    %c0_10 = arith.constant 0 : index
    %13 = vector.load %arg7[%c0_9, %c0_10] : memref<256x256xbf16, #tpu.memory_space<vmem>>, vector<256x256xbf16>
    %cst_11 = arith.constant dense<0.000000e+00> : vector<8x256xf32>
    %14 = tpu.matmul %0, %13, %cst_11 {dimension_numbers = #tpu.dot_dimension_numbers<[1], [0], [0], [1], [0, 0, 1, 1], [], []>} : vector<8x256xbf16>, vector<256x256xbf16>, vector<8x256xf32> -> vector<8x256xf32>
    %15 = arith.truncf %12 : vector<8x32xf32> to vector<8x32xbf16>
    %c0_12 = arith.constant 0 : index
    %c0_13 = arith.constant 0 : index
    %16 = vector.load %arg8[%c0_12, %c0_13] : memref<32x256xbf16, #tpu.memory_space<vmem>>, vector<32x256xbf16>
    %cst_14 = arith.constant dense<0.000000e+00> : vector<8x256xf32>
    %17 = tpu.matmul %15, %16, %cst_14 {dimension_numbers = #tpu.dot_dimension_numbers<[1], [0], [0], [1], [0, 0, 1, 1], [], []>} : vector<8x32xbf16>, vector<32x256xbf16>, vector<8x256xf32> -> vector<8x256xf32>
    %18 = arith.addf %14, %17 : vector<8x256xf32>
    %c0_15 = arith.constant 0 : index
    %c0_16 = arith.constant 0 : index
    %19 = vector.load %arg9[%c0_15, %c0_16] : memref<1x256xf32, #tpu.memory_space<vmem>>, vector<1x256xf32>
    %20 = vector.broadcast %19 : vector<1x256xf32> to vector<8x256xf32>
    %21 = arith.addf %18, %20 : vector<8x256xf32>
    %c0_17 = arith.constant 0 : index
    %c0_18 = arith.constant 0 : index
    %22 = vector.load %arg2[%c0_17, %c0_18] : memref<8x256xbf16, #tpu.memory_space<vmem>>, vector<8x256xbf16>
    %23 = arith.extf %22 : vector<8x256xbf16> to vector<8x256xf32>
    %c0_19 = arith.constant 0 : index
    %c0_20 = arith.constant 0 : index
    %24 = vector.load %arg3[%c0_19, %c0_20] : memref<8x256xbf16, #tpu.memory_space<vmem>>, vector<8x256xbf16>
    %25 = arith.extf %24 : vector<8x256xbf16> to vector<8x256xf32>
    %c0_21 = arith.constant 0 : index
    %c0_22 = arith.constant 0 : index
    %26 = vector.load %arg10[%c0_21, %c0_22] : memref<256x8xf32, #tpu.memory_space<vmem>>, vector<256x8xf32>
    %27 = arith.mulf %21, %23 : vector<8x256xf32>
    %cst_23 = arith.constant dense<0.000000e+00> : vector<8x8xf32>
    %28 = tpu.matmul %27, %26, %cst_23 {dimension_numbers = #tpu.dot_dimension_numbers<[1], [0], [0], [1], [0, 0, 1, 1], [], []>} : vector<8x256xf32>, vector<256x8xf32>, vector<8x8xf32> -> vector<8x8xf32>
    %c0_24 = arith.constant 0 : index
    %c0_25 = arith.constant 0 : index
    %29 = vector.load %arg11[%c0_24, %c0_25] : memref<8x8xf32, #tpu.memory_space<vmem>>, vector<8x8xf32>
    tpu.vector_store %arg11[%c0_24, %c0_25], %28 {strides = array<i32>} : memref<8x8xf32, #tpu.memory_space<vmem>>, vector<8x8xf32>,
    %30 = arith.mulf %21, %25 : vector<8x256xf32>
    %cst_26 = arith.constant dense<0.000000e+00> : vector<8x8xf32>
    %31 = tpu.matmul %30, %26, %cst_26 {dimension_numbers = #tpu.dot_dimension_numbers<[1], [0], [0], [1], [0, 0, 1, 1], [], []>} : vector<8x256xf32>, vector<256x8xf32>, vector<8x8xf32> -> vector<8x8xf32>
    %c0_27 = arith.constant 0 : index
    %c0_28 = arith.constant 0 : index
    %32 = vector.load %arg12[%c0_27, %c0_28] : memref<8x8xf32, #tpu.memory_space<vmem>>, vector<8x8xf32>
    tpu.vector_store %arg12[%c0_27, %c0_28], %31 {strides = array<i32>} : memref<8x8xf32, #tpu.memory_space<vmem>>, vector<8x8xf32>,
    return
  }
  func.func @transform_0(%arg0: i32) -> (i32, i32) {
    %c0_i32 = arith.constant 0 : i32
    %c0_i32_0 = arith.constant 0 : i32
    return %arg0, %c0_i32 : i32, i32
  }
  func.func @transform_1(%arg0: i32) -> (i32, i32) {
    %c0_i32 = arith.constant 0 : i32
    %c0_i32_0 = arith.constant 0 : i32
    return %arg0, %c0_i32 : i32, i32
  }
  func.func @transform_2(%arg0: i32) -> (i32, i32) {
    %c0_i32 = arith.constant 0 : i32
    %c0_i32_0 = arith.constant 0 : i32
    return %arg0, %c0_i32 : i32, i32
  }
  func.func @transform_3(%arg0: i32) -> (i32, i32) {
    %c0_i32 = arith.constant 0 : i32
    %c0_i32_0 = arith.constant 0 : i32
    %c0_i32_1 = arith.constant 0 : i32
    return %c0_i32, %c0_i32_0 : i32, i32
  }
  func.func @transform_4(%arg0: i32) -> (i32, i32) {
    %c0_i32 = arith.constant 0 : i32
    %c0_i32_0 = arith.constant 0 : i32
    %c0_i32_1 = arith.constant 0 : i32
    return %c0_i32, %c0_i32_0 : i32, i32
  }
  func.func @transform_5(%arg0: i32) -> (i32, i32) {
    %c0_i32 = arith.constant 0 : i32
    %c0_i32_0 = arith.constant 0 : i32
    %c0_i32_1 = arith.constant 0 : i32
    return %c0_i32, %c0_i32_0 : i32, i32
  }
  func.func @transform_6(%arg0: i32) -> (i32, i32) {
    %c0_i32 = arith.constant 0 : i32
    %c0_i32_0 = arith.constant 0 : i32
    %c0_i32_1 = arith.constant 0 : i32
    return %c0_i32, %c0_i32_0 : i32, i32
  }
  func.func @transform_7(%arg0: i32) -> (i32, i32) {
    %c0_i32 = arith.constant 0 : i32
    %c0_i32_0 = arith.constant 0 : i32
    %c0_i32_1 = arith.constant 0 : i32
    return %c0_i32, %c0_i32_0 : i32, i32
  }
  func.func @transform_8(%arg0: i32) -> (i32, i32) {
    %c0_i32 = arith.constant 0 : i32
    %c0_i32_0 = arith.constant 0 : i32
    %c0_i32_1 = arith.constant 0 : i32
    return %c0_i32, %c0_i32_0 : i32, i32
  }
  func.func @transform_9(%arg0: i32) -> (i32, i32) {
    %c0_i32 = arith.constant 0 : i32
    %c0_i32_0 = arith.constant 0 : i32
    %c0_i32_1 = arith.constant 0 : i32
    return %c0_i32, %c0_i32_0 : i32, i32
  }
  func.func @transform_10(%arg0: i32) -> (i32, i32) {
    %c0_i32 = arith.constant 0 : i32
    %c0_i32_0 = arith.constant 0 : i32
    return %arg0, %c0_i32 : i32, i32
  }
  func.func @transform_11(%arg0: i32) -> (i32, i32) {
    %c0_i32 = arith.constant 0 : i32
    %c0_i32_0 = arith.constant 0 : i32
    return %arg0, %c0_i32 : i32, i32
  }
}

</mosaic_0001>

<bundles_post_ra>
// kernel: tpu_custom_call.1
= control target key start
LH: loop header
LB: loop body
LE: loop exit
PB: predicated region body
PF: predicated region fallthrough
CT: control target
= control target key end

     0   :  { %s2903_s0 = inlined_call_operand.vmem [shape: bf16[16,256], index: 0, kind: input, shape index: {}]   ;;  %s2904_s1 = inlined_call_operand.hbm [shape: bf16[16,256], index: 1, kind: input, shape index: {}]   ;;  %s2905_s2 = inlined_call_operand.hbm [shape: bf16[16,256], index: 2, kind: input, shape index: {}]   ;;  %s2906_s3 = inlined_call_operand.vmem [shape: bf16[256,256], index: 3, kind: input, shape index: {}]   ;;  %s2907_s4 = inlined_call_operand.hbm [shape: f32[1,256], index: 4, kind: input, shape index: {}]   ;;  %s2908_s5 = inlined_call_operand.hbm [shape: f32[1,32], index: 5, kind: input, shape index: {}]   ;;  %s2909_s6 = inlined_call_operand.hbm [shape: bf16[256,256], index: 6, kind: input, shape index: {}]   ;;  %s2910_s7 = inlined_call_operand.hbm [shape: bf16[32,256], index: 7, kind: input, shape index: {}]   ;;  %s2911_s8 = inlined_call_operand.hbm [shape: f32[1,256], index: 8, kind: input, shape index: {}]   ;;  %s2912_s9 = inlined_call_operand.vmem [shape: f32[256,8], index: 9, kind: input, shape index: {}]   ;;  %s2913_s10 = inlined_call_operand.vmem [shape: f32[16,8], index: 10, kind: output, shape index: {0}]   ;;  %s2914_s11 = inlined_call_operand.vmem [shape: f32[16,8], index: 11, kind: output, shape index: {1}]  }
   0x1   :  { %2918 = sst [smem:[#allocation18_spill]] %s2907_s4 }
   0x2   :  { %2919 = sst [smem:[#allocation19_spill]] %s2908_s5 }
   0x3   :  { %2920 = sst [smem:[#allocation20_spill]] %s2909_s6 }
   0x4   :  { %2921 = sst [smem:[#allocation21_spill]] %s2910_s7 }
   0x5   :  { %2922 = sst [smem:[#allocation22_spill]] %s2911_s8 }
   0x6   :  { %17 = vsyncpa [#allocation3], 0 }
   0x7   :  { %19 = vsyncpa [#allocation3 + $0x1], 0 }
   0x8   :  { %20 = vsyncpa [#allocation5], 0 }
   0x9   :  { %22 = vsyncpa [#allocation5 + $0x1], 0 }
   0xa   :  { %23 = vsyncpa [#allocation8], 0 }
   0xb   :  { %24 = vsyncpa [#allocation11], 0  ;;  %s2445_s17 = smov 0   ;;  %s2447_s18 = smov 0  }
   0xc   :  { %s2449_s19 = smov 0   ;;  %s2451_s20 = smov 0  }
   0xd LB: > { %s2370_s21 = smov [#allocation6]   ;;  %s2466_s23 = sadd.s32 4294967295, %s2368_s20   ;;  %s2368_s20 = sphi %s2451_s20, %s2945_s20   ;;  %s2364_s19 = sphi %s2449_s19, %s2944_s19   ;;  %s2360_s18 = sphi %s2447_s18, %s2943_s18   ;;  %s2356_s17 = sphi %s2445_s17, %s2942_s17  }
   0xe   : > { %s328_s22 = sshll.u32 %s2370_s21, 4  ;;  %p1753_p0 = scmp.ge.s32.totalorder %s2368_s20, 1  ;;  %s329_s22 = int_to_ptr.vmem [resolvable:$true] %s328_s22 }
   0xf   : > { %p2915_p1 = scmp.eq.s32.totalorder %s2466_s23, 0  ;;  %p312_p2 = scmp.lt.s32.totalorder %s2368_s20, 3 }
  0x10   : > { %s2371_s25 = smov [#allocation7]   ;;  %s2372_s28 = smov [#allocation10]  }
  0x11   : > { %p2471_p3 = pnand %p1753_p0, %p312_p2  ;;  %s339_s26 = sshll.u32 %s2371_s25, 4  ;;  %s340_s26 = int_to_ptr.vmem [resolvable:$true] %s339_s26 }
  0x12   : > { %s362_s29 = sshll.u32 %s2372_s28, 4  ;;  %s2143_s12 = scalar_lea.vmem %s329_s22, 32  ;;  %s2483_s29 = int_to_ptr.vmem [resolvable:$true] %s362_s29 }
  0x13   : > { %s2923_s24 = scalar_select %p2471_p3, 1, 0 }
  0x14   : > { %p1949_p4 = pneg %p2471_p3  ;;  %p2144_p7 = scmp.ne.s32.totalorder %s329_s22, %s2143_s12 }
  0x15   : > { %p2151_p10 = scmp.lt.s32.totalorder %s329_s22, %s329_s22  ;;  %p2152_p11 = scmp.lt.s32.totalorder %s2143_s12, %s2143_s12 }
  0x16   : > { %p2479_p5 = pnand %p1949_p4, %p2915_p1 }
  0x17   : > { %p2153_p12 = por %p2152_p11, %p2151_p10 }
  0x18   : > { %p2487_p6 = pneg %p2479_p5 }
  0x1a   : > { %p2146_p8 = pnand %p2144_p7, %p2487_p6 }
  0x1c   : > { %p2147_p9 = pneg %p2146_p8 }
  0x1e   : > { %p2154_p13 = pnand %p2153_p12, %p2147_p9 }
  0x20   : > { %2157 = shalt.err (!%p2154_p13)
}
  0x21   : > { %s2926_s4 = sld [smem:[#allocation18_spill]]  ;;  %s2169_s15 = scalar_lea.vmem %s340_s26, 16 }
  0x22   : > { %p2170_p0 = scmp.ne.s32.totalorder %s340_s26, %s2169_s15  ;;  %s2176_s16 = scalar_lea.vmem %s340_s26, 32 }
  0x23   : > { %p2177_p7 = scmp.lt.s32.totalorder %s340_s26, %s340_s26  ;;  %p2178_p8 = scmp.lt.s32.totalorder %s2176_s16, %s2169_s15 }
  0x24   : > { %p2172_p2 = pnand %p2170_p0, %p2487_p6 }
  0x25   : > { %p2179_p1 = por %p2178_p8, %p2177_p7 }
  0x26   : > { %p2173_p4 = pneg %p2172_p2 }
  0x27   : > { %1952 = dma.hbm_to_vmem [thread:$0]  (!%p2479_p5), %s2926_s4, 32, %s329_s22, [#allocation5]  }
  0x28   : > { %p2180_p3 = pnand %p2179_p1, %p2173_p4 }
  0x2a   : > { %2183 = shalt.err (!%p2180_p3)
}
  0x2b   : > { %s2927_s5 = sld [smem:[#allocation19_spill]]  ;;  %s2195_s22 = scalar_lea.vmem %s2483_s29, 512 }
  0x2c   : > { %p2196_p9 = scmp.ne.s32.totalorder %s2483_s29, %s2195_s22  ;;  %p2203_p12 = scmp.lt.s32.totalorder %s2483_s29, %s2483_s29 }
  0x2d   : > { %p2204_p13 = scmp.lt.s32.totalorder %s2195_s22, %s2195_s22 }
  0x2e   : > { %p2198_p10 = pnand %p2196_p9, %p2487_p6 }
  0x2f   : > { %p2205_p1 = por %p2204_p13, %p2203_p12 }
  0x30   : > { %p2199_p11 = pneg %p2198_p10 }
  0x31   : > { %1955 = dma.hbm_to_vmem [thread:$0]  (!%p2479_p5), %s2927_s5, 16, %s340_s26, [#allocation8]  }
  0x32   : > { %p2206_p3 = pnand %p2205_p1, %p2199_p11 }
  0x34   : > { %2209 = shalt.err (!%p2206_p3)
}
  0x35   : > { %s2373_s28 = smov 128   ;;  %s2374_s12 = smov 8  }
  0x36   : > { %s2928_s7 = sld [smem:[#allocation21_spill]]  ;;  %s2375_s26 = smov [#allocation9]  }
  0x37   : > { %s349_s15 = sshll.u32 %s2375_s26, 4  ;;  %s2376_s16 = smov [#allocation12]   ;;  %s350_s15 = int_to_ptr.vmem [resolvable:$true] %s349_s15 }
  0x38   : > { %s376_s21 = sshll.u32 %s2376_s16, 4  ;;  %s2221_s25 = scalar_lea.vmem %s350_s15, 4096  ;;  %s377_s21 = int_to_ptr.vmem [resolvable:$true] %s376_s21 }
  0x39   : > { %p2222_p0 = scmp.ne.s32.totalorder %s350_s15, %s2221_s25  ;;  %p2229_p7 = scmp.lt.s32.totalorder %s350_s15, %s350_s15 }
  0x3a   : > { %p2230_p8 = scmp.lt.s32.totalorder %s2221_s25, %s2221_s25 }
  0x3b   : > { %p2224_p2 = pnand %p2222_p0, %p2487_p6 }
  0x3c   : > { %1961 = dma.hbm_to_vmem [thread:$0]  (!%p2479_p5), %s2928_s7, 512, %s2483_s29, [#allocation11], %s2373_s28, %s2373_s28, %s2374_s12  }
  0x3d   : > { %p2225_p4 = pneg %p2224_p2  ;;  %p2231_p9 = por %p2230_p8, %p2229_p7 }
  0x3f   : > { %p2232_p10 = pnand %p2231_p9, %p2225_p4 }
  0x41   : > { %2235 = shalt.err (!%p2232_p10)
}
  0x42   : > { %s2929_s6 = sld [smem:[#allocation20_spill]]  ;;  %s2247_s29 = scalar_lea.vmem %s377_s21, 32 }
  0x43   : > { %p2248_p11 = scmp.ne.s32.totalorder %s377_s21, %s2247_s29  ;;  %p2255_p1 = scmp.lt.s32.totalorder %s377_s21, %s377_s21 }
  0x44   : > { %p2256_p3 = scmp.lt.s32.totalorder %s2247_s29, %s2247_s29 }
  0x45   : > { %p2250_p12 = pnand %p2248_p11, %p2487_p6 }
  0x46   : > { %p2257_p0 = por %p2256_p3, %p2255_p1 }
  0x47   : > { %p2251_p13 = pneg %p2250_p12 }
  0x48   : > { %1958 = dma.hbm_to_vmem [thread:$0]  (!%p2479_p5), %s2929_s6, 4096, %s350_s15, [#allocation8], %s2373_s28, %s2373_s28, %s2374_s12  }
  0x49   : > { %p2258_p2 = pnand %p2257_p0, %p2251_p13 }
  0x4b   : > { %2261 = shalt.err (!%p2258_p2)
}
  0x4c   : > { %s2930_s8 = sld [smem:[#allocation22_spill]]  ;;  %s2532_s30 = sadd.s32 1, %s2368_s20  }
  0x4d   : > { %s60_s27 = ssub.s32 %s2368_s20, %s2532_s30  ;;  %s63_s28 = sadd.s32 1, %s2364_s19 }
  0x4e   : > { %p61_p6 = scmp.eq.s32.totalorder %s60_s27, 0  ;;  %p70_p4 = scmp.ne.s32.totalorder %s2364_s19, %s2360_s18 }
  0x4f   : > { %p71_p7 = scmp.eq.s32.totalorder %s2368_s20, 0  ;;  %p76_p8 = scmp.ne.s32.totalorder %s2360_s18, %s2356_s17 }
  0x50   : > { %s2543_s12 = scalar_select %p61_p6, %s2364_s19, %s63_s28  }
  0x51   : > { %p72_p9 = por %p71_p7, %p70_p4  ;;  %p2931_p10 = scmp.eq.s32.totalorder %s2466_s23, 0 }
  0x52   : > { %1964 = dma.hbm_to_vmem [thread:$0]  (!%p2479_p5), %s2930_s8, 32, %s377_s21, [#allocation11]  }
  0x53   : > { %p2547_p11 = por %p2931_p10, %p76_p8  ;;  %p1977_p12 = scmp.lt.s32.totalorder %s2368_s20, 2 }
  0x54   : > { %s398_s16 = sand.u32 1, %s2364_s19   ;;  %s1852_s25 = sshll.u32 %s2368_s20, 7 }
  0x55   : > { %s2932_s15 = scalar_select %p2547_p11, 1, 0 }
  0x56   : > { %s2553_s21 = sshll.u32 %s398_s16, 3  ;;  %s2559_s29 = scalar_lea.hbm %s2904_s1, %s1852_s25 }
  0x57   : > { %s402_s17 = scalar_lea.vmem [#allocation2], %s2553_s21  ;;  %p2564_p5 = pnand %p1977_p12, %p72_p9 }
  0x58   : > { %s410_s14 = sshll.u32 %s402_s17, 4  ;;  %s2571_s4 = scalar_lea.hbm %s2905_s2, %s1852_s25  ;;  %s2562_s14 = int_to_ptr.vmem [resolvable:$true] %s410_s14 }
  0x59   : > { %s417_s22 = sand.u32 1, %s2368_s20   ;;  %s399_s13 = scalar_lea.sflag [#allocation3], %s398_s16 }
  0x5a   : > { %s2262_s5 = scalar_lea.hbm %s2559_s29, 128  ;;  %p2264_p1 = pneg %p2564_p5 }
  0x5b   : > { %p2263_p13 = scmp.ne.s32.totalorder %s2559_s29, %s2262_s5  ;;  %s2267_s7 = scalar_lea.hbm %s2904_s1, 256 }
  0x5c   : > { %p2268_p2 = scmp.lt.s32.totalorder %s2559_s29, %s2904_s1  ;;  %p2269_p6 = scmp.lt.s32.totalorder %s2267_s7, %s2262_s5 }
  0x5d   : > { %p2265_p3 = pnand %p2264_p1, %p2263_p13 }
  0x5e   : > { %p2270_p4 = por %p2269_p6, %p2268_p2 }
  0x5f   : > { %p2266_p0 = pneg %p2265_p3 }
  0x61   : > { %p2271_p7 = pnand %p2270_p4, %p2266_p0 }
  0x63   : > { %2274 = shalt.err (!%p2271_p7)
}
  0x64   : > { %s2275_s16 = scalar_lea.vmem %s2562_s14, 128  ;;  %s2377_s6 = smov [#allocation2]  }
  0x65   : > { %p2276_p8 = scmp.ne.s32.totalorder %s2562_s14, %s2275_s16  ;;  %s2280_s25 = sshll.u32 %s2377_s6, 4  ;;  %s2281_s25 = int_to_ptr.vmem [resolvable:$false] %s2280_s25 }
  0x66   : > { %s2282_s28 = scalar_lea.vmem %s2281_s25, 256  ;;  %p2283_p12 = scmp.lt.s32.totalorder %s2562_s14, %s2281_s25 }
  0x67   : > { %p2278_p9 = pnand %p2276_p8, %p2264_p1  ;;  %p2284_p13 = scmp.lt.s32.totalorder %s2282_s28, %s2275_s16 }
  0x69   : > { %p2279_p10 = pneg %p2278_p9  ;;  %p2285_p3 = por %p2284_p13, %p2283_p12 }
  0x6b   : > { %p2286_p2 = pnand %p2285_p3, %p2279_p10 }
  0x6d   : > { %2289 = shalt.err (!%p2286_p2)
}
  0x6e   : > { %1968 = dma.hbm_to_vmem [thread:$0]  (!%p2564_p5), %s2559_s29, 128, %s2562_s14, %s399_s13  }
  0x6f   : > { %s421_s5 = scalar_lea.vmem [#allocation4], %s2553_s21  ;;  %s418_s8 = scalar_lea.sflag [#allocation5], %s417_s22 }
  0x70   : > { %s429_s7 = sshll.u32 %s421_s5, 4  ;;  %s2290_s17 = scalar_lea.hbm %s2571_s4, 128  ;;  %s430_s7 = int_to_ptr.vmem [resolvable:$true] %s429_s7 }
  0x71   : > { %p2291_p0 = scmp.ne.s32.totalorder %s2571_s4, %s2290_s17  ;;  %s2295_s6 = scalar_lea.hbm %s2905_s2, 256 }
  0x72   : > { %p2296_p7 = scmp.lt.s32.totalorder %s2571_s4, %s2905_s2  ;;  %p2297_p8 = scmp.lt.s32.totalorder %s2295_s6, %s2290_s17 }
  0x73   : > { %p2293_p6 = pnand %p2291_p0, %p2264_p1 }
  0x74   : > { %p2298_p9 = por %p2297_p8, %p2296_p7 }
  0x75   : > { %p2294_p4 = pneg %p2293_p6 }
  0x77   : > { %p2299_p10 = pnand %p2298_p9, %p2294_p4 }
  0x79   : > { %2302 = shalt.err (!%p2299_p10)
}
  0x7a   : > { %s2303_s20 = scalar_lea.vmem %s430_s7, 128  ;;  %s2378_s21 = smov [#allocation4]  }
  0x7b   : > { %p2304_p12 = scmp.ne.s32.totalorder %s430_s7, %s2303_s20  ;;  %s2308_s29 = sshll.u32 %s2378_s21, 4  ;;  %s2309_s29 = int_to_ptr.vmem [resolvable:$false] %s2308_s29 }
  0x7c   : > { %s2310_s14 = scalar_lea.vmem %s2309_s29, 256  ;;  %p2311_p2 = scmp.lt.s32.totalorder %s430_s7, %s2309_s29 }
  0x7d   : > { %p2306_p13 = pnand %p2304_p12, %p2264_p1  ;;  %p2312_p0 = scmp.lt.s32.totalorder %s2310_s14, %s2303_s20 }
  0x7f   : > { %p2307_p3 = pneg %p2306_p13  ;;  %p2313_p6 = por %p2312_p0, %p2311_p2 }
  0x81   : > { %p2314_p11 = pnand %p2313_p6, %p2307_p3 }
  0x83   : > { %2317 = shalt.err (!%p2314_p11)
}
  0x84   : > { %1971 = dma.hbm_to_vmem [thread:$0]  (!%p2564_p5), %s2571_s4, 128, %s430_s7, %s418_s8  }
  0x85   : > { %p2934_p4 = scmp.ne.s32.totalorder %s2923_s24, 0 }
  0x86   : > { %s440_s22 = sand.u32 (!%p2934_p4), 1, %s2360_s18   ;;  %p2935_p1 = scmp.ne.s32.totalorder (!%p2934_p4), %s2932_s15, 0 }
  0x87   : > { %438 = sbr.rel (%p2934_p4) target bundleno = 1043 (0x413), region = 60  ;;  %s2622_s13 = sshll.u32 (!%p2934_p4), %s440_s22, 3 }
  0x88   : > { %s441_s5 = scalar_lea.sflag (!%p2934_p4), [#allocation3], %s440_s22  ;;  %s444_s17 = scalar_lea.vmem (!%p2934_p4), [#allocation2], %s2622_s13 }
  0x8c   : > { %2335 = dma.done.wait (%p2935_p1), %s441_s5, 128  }
  0x8d   : > { %2337 = vsyncadd (%p2935_p1), %s441_s5, 4294967168  ;;  %s449_s4 = sand.u32 1, %s2466_s23   ;;  %s453_s24 = scalar_lea.vmem [#allocation4], %s2622_s13 }
  0x8e   : > { %s450_s26 = scalar_lea.sflag [#allocation5], %s449_s4 }
  0x8f   : > { %2339 = dma.done.wait (%p2935_p1), %s450_s26, 128  }
  0x90   : > { %2341 = vsyncadd (%p2935_p1), %s450_s26, 4294967168  ;;  %p2936_p11 = scmp.eq.s32.totalorder %s2466_s23, 0 }
  0x92   : > { %2343 = dma.done.wait (%p2936_p11), [#allocation5], 32   ;;  %p2937_p5 = pmov %p2936_p11 }
  0x94   : > { %2345 = vsyncadd (%p2937_p5), [#allocation5], 4294967264  ;;  %p2938_p7 = pmov %p2937_p5 }
  0x95   : > { %p2939_p8 = pmov %p2937_p5 }
  0x96   : > { %2347 = dma.done.wait (%p2938_p7), [#allocation8], 4112  }
  0x97   : > { %2349 = vsyncadd (%p2939_p8), [#allocation8], 4294963184  ;;  %p2940_p9 = pmov %p2937_p5 }
  0x98   : > { %p2941_p10 = pmov %p2937_p5 }
  0x99   : > { %2351 = dma.done.wait (%p2940_p9), [#allocation11], 544  }
  0x9a   : > { %2353 = vsyncadd (%p2941_p10), [#allocation11], 4294966752  ;;  %v2028_v0 = vld [vmem:[%s2906_s3 + $0x74] ss:$8 sps:$4 sm:$0xff]   ;;  %v2030_v1 = vld [vmem:[%s2906_s3 + $0x70] ss:$8 sps:$4 sm:$0xff]   ;;  %v574_v35 = vlaneseq }
  0x9b   : > { %751 = vmatprep.subr.bf16.mxu0 %v2028_v0  ;;  %v2031_v2 = vld [vmem:[%s2906_s3 + $0x64] ss:$8 sps:$4 sm:$0xff]   ;;  %v2033_v3 = vld [vmem:[%s2906_s3 + $0x60] ss:$8 sps:$4 sm:$0xff]   ;;  %v2034_v4 = vld [vmem:[%s2906_s3 + $0x54] ss:$8 sps:$4 sm:$0xff]  }
  0x9c   : > { %752 = vmatpush1.bf16.msra.mxu0 %v2030_v1  ;;  %v2036_v5 = vld [vmem:[%s2906_s3 + $0x50] ss:$8 sps:$4 sm:$0xff]   ;;  %p525_p12 = scmp.lt.s32.totalorder %s2466_s23, 1  ;;  %v2037_v6 = vld [vmem:[%s2906_s3 + $0x44] ss:$8 sps:$4 sm:$0xff]   ;;  %v2757_v36 = vshrl.u32 %v574_v35, 7 }
  0x9d   : > { %753 = vmatprep.subr.bf16.mxu0 %v2031_v2  ;;  %v2039_v7 = vld [vmem:[%s2906_s3 + $0x40] ss:$8 sps:$4 sm:$0xff]   ;;  %v2040_v8 = vld [vmem:[%s2906_s3 + $0x34] ss:$8 sps:$4 sm:$0xff]   ;;  %v2042_v9 = vld [vmem:[%s2906_s3 + $0x30] ss:$8 sps:$4 sm:$0xff]  }
  0x9e   : > { %s2947_s23 = smov (!%p525_p12, %s2466_s23), 1  ;;  %v2043_v10 = vld [vmem:[%s2906_s3 + $0x24] ss:$8 sps:$4 sm:$0xff]   ;;  %v2045_v11 = vld [vmem:[%s2906_s3 + $0x20] ss:$8 sps:$4 sm:$0xff]   ;;  %v576_v37 = vsub.s32 0, %v2757_v36 }
  0x9f   : > { %s2679_s16 = sshll.u32 %s2947_s23, 3  ;;  %v2046_v12 = vld [vmem:[%s2906_s3 + $0x14] ss:$8 sps:$4 sm:$0xff]   ;;  %v2048_v13 = vld [vmem:[%s2906_s3 + $0x10] ss:$8 sps:$4 sm:$0xff]   ;;  %v580_v40 = vsub.s32 1, %v2757_v36 }
  0xa0   : > { %754 = vmatpush1.bf16.msra.mxu0 %v2033_v3  ;;  %s529_s21 = scalar_lea.vmem %s2903_s0, %s2679_s16  ;;  %v2049_v15 = vld [vmem:[%s2906_s3 + $0x4] ss:$8 sps:$4 sm:$0xff]   ;;  %v2051_v17 = vld [vmem:[%s2906_s3] ss:$8 sps:$4 sm:$0xff]   ;;  %v2052_v18 = vld [vmem:[%s2906_s3 + $0xf4] ss:$8 sps:$4 sm:$0xff]  }
  0xa1   : > { %755 = vmatprep.subr.bf16.mxu0 %v2034_v4  ;;  %v539_v14 = vld [vmem:[%s529_s21] sm:$0xff]  ;;  %v2054_v19 = vld [vmem:[%s2906_s3 + $0xf0] ss:$8 sps:$4 sm:$0xff]   ;;  %v2058_v22 = vld [vmem:[%s2906_s3 + $0xd4] ss:$8 sps:$4 sm:$0xff]   ;;  %s2379_s27 = smov 32   ;;  %s537_s21 = scalar_lea.vmem %s2914_s11, %s2679_s16 }
  0xa2   : > { %v2700_v16 = vcombine.high %v539_v14, %v539_v14  ;;  %v2055_v20 = vld [vmem:[%s2906_s3 + $0xe4] ss:$8 sps:$4 sm:$0xff]   ;;  %v2057_v21 = vld [vmem:[%s2906_s3 + $0xe0] ss:$8 sps:$4 sm:$0xff]   ;;  %v2060_v23 = vld [vmem:[%s2906_s3 + $0xd0] ss:$8 sps:$4 sm:$0xff]   ;;  %v2754_v34 = vcombine.low %v539_v14, %v539_v14 }
  0xa3   : > { %v2061_v24 = vld [vmem:[%s2906_s3 + $0xc4] ss:$8 sps:$4 sm:$0xff]   ;;  %v2063_v25 = vld [vmem:[%s2906_s3 + $0xc0] ss:$8 sps:$4 sm:$0xff]   ;;  %v2064_v26 = vld [vmem:[%s2906_s3 + $0xb4] ss:$8 sps:$4 sm:$0xff]  }
  0xa4   : > { %756 = vmatpush1.bf16.msra.mxu0 %v2036_v5  ;;  %783 = vmatprep.mubr.bf16.mxu0 %v2700_v16  ;;  %v2066_v27 = vld [vmem:[%s2906_s3 + $0xb0] ss:$8 sps:$4 sm:$0xff]   ;;  %v2067_v28 = vld [vmem:[%s2906_s3 + $0xa4] ss:$8 sps:$4 sm:$0xff]   ;;  %v2069_v29 = vld [vmem:[%s2906_s3 + $0xa0] ss:$8 sps:$4 sm:$0xff]  }
  0xa5   : > { %757 = vmatprep.subr.bf16.mxu0 %v2037_v6  ;;  %v2070_v30 = vld [vmem:[%s2906_s3 + $0x94] ss:$8 sps:$4 sm:$0xff]   ;;  %v2072_v31 = vld [vmem:[%s2906_s3 + $0x90] ss:$8 sps:$4 sm:$0xff]   ;;  %v2073_v32 = vld [vmem:[%s2906_s3 + $0x84] ss:$8 sps:$4 sm:$0xff]  }
  0xa6   : > { %v2075_v33 = vld [vmem:[%s2906_s3 + $0x80] ss:$8 sps:$4 sm:$0xff]   ;;  %s2380_s6 = smov 96   ;;  %s2381_s25 = smov 64   ;;  %v2080_v49 = vld [vmem:[#allocation10 + $0x10] ss:$8 sps:$4 sm:$0xff]  }
  0xa7   : > { %v572_v38 = vld [vmem:[#allocation6] sm:$0x3]  ;;  %v2081_v50 = vld [vmem:[#allocation10 + $0x4] ss:$8 sps:$4 sm:$0xff]   ;;  %v2382_v51 = vmov 0   ;;  %vm948_vm0 = vcmask 261120  }
  0xa8   : > { %758 = vmatpush1.bf16.msra.mxu0 %v2039_v7  ;;  %v577_v39 = vrot.slane %v572_v38, %v576_v37  ;;  %v581_v43 = vrot.slane %v572_v38, %v580_v40  ;;  %v2078_v48 = vld [vmem:[#allocation10 + $0x14] ss:$8 sps:$4 sm:$0xff]   ;;  %1165 = vmatprep.mubr.bf16.mxu1 %v2382_v51  ;;  %v2083_v52 = vld [vmem:[#allocation10] ss:$8 sps:$4 sm:$0xff]   ;;  %v2383_v54 = vmov 1983009808  }
  0xa9   : > { %759 = vmatprep.subr.bf16.mxu0 %v2040_v8  ;;  %1145 = vmatprep.subr.bf16.mxu1 %v2078_v48  ;;  %v2086_v53 = vld [vmem:[#allocation9 + $0x74] ss:$8 sps:$4 sm:$0xff]   ;;  %v815_v55 = vunpack.c.l.s4 %v2383_v54  ;;  %v2384_v59 = vmov 1934713408   ;;  %vm1089_vm1 = vcmask 1041409   ;;  %vm1092_vm2 = vcmask 1042434  }
  0xaa   : > { %1146 = vmatpush1.bf16.msra.mxu1 %v2080_v49  ;;  %v879_v60 = vunpack.c.l.s4 %v2384_v59  ;;  %vm1095_vm3 = vcmask 1043459   ;;  %vm1098_vm4 = vcmask 1044484   ;;  %vm1101_vm5 = vcmask 1045509  }
  0xab   : > { %1147 = vmatprep.subr.bf16.mxu1 %v2081_v50  ;;  %v816_v58 = vunpack.c.0.s8 %v815_v55  ;;  %vm1104_vm6 = vcmask 1046534   ;;  %vm1107_vm7 = vcmask 1047559   ;;  %vm1499_vm8 = vcmask 64512  }
  0xac   : > { %760 = vmatpush1.bf16.msra.mxu0 %v2042_v9  ;;  %v880_v3 = vunpack.c.0.s8 %v879_v60 }
  0xad   : > { %761 = vmatprep.subr.bf16.mxu0 %v2043_v10  ;;  %v819_v63 = vsub.s32 %v816_v58, %v2757_v36 }
  0xae   : > { %1148 = vmatpush1.bf16.msra.mxu1 %v2083_v52  ;;  %v883_v14 = vsub.s32 %v880_v3, %v2757_v36 }
  0xaf   : > { %1334 = vmatprep.subr.bf16.mxu1 %v2086_v53 }
  0xb0   : > { %762 = vmatpush1.bf16.msra.mxu0 %v2045_v11 }
  0xb1   : > { %763 = vmatprep.subr.bf16.mxu0 %v2046_v12 }
  0xb4   : > { %764 = vmatpush1.bf16.msra.mxu0 %v2048_v13 }
  0xb5   : > { %765 = vmatprep.subr.bf16.mxu0 %v2049_v15 }
  0xb8   : > { %766 = vmatpush1.bf16.msra.mxu0 %v2051_v17 }
  0xb9   : > { %767 = vmatprep.subr.bf16.mxu0 %v2052_v18 }
  0xbc   : > { %768 = vmatpush2.bf16.msra.mxu0 %v2054_v19 }
  0xbd   : > { %769 = vmatprep.subr.bf16.mxu0 %v2055_v20 }
  0xc0   : > { %770 = vmatpush2.bf16.msra.mxu0 %v2057_v21 }
  0xc1   : > { %771 = vmatprep.subr.bf16.mxu0 %v2058_v22 }
  0xc4   : > { %772 = vmatpush2.bf16.msra.mxu0 %v2060_v23 }
  0xc5   : > { %773 = vmatprep.subr.bf16.mxu0 %v2061_v24 }
  0xc8   : > { %774 = vmatpush2.bf16.msra.mxu0 %v2063_v25 }
  0xc9   : > { %775 = vmatprep.subr.bf16.mxu0 %v2064_v26 }
  0xcc   : > { %776 = vmatpush2.bf16.msra.mxu0 %v2066_v27 }
  0xcd   : > { %777 = vmatprep.subr.bf16.mxu0 %v2067_v28 }
  0xd0   : > { %778 = vmatpush2.bf16.msra.mxu0 %v2069_v29 }
  0xd1   : > { %779 = vmatprep.subr.bf16.mxu0 %v2070_v30 }
  0xd4   : > { %780 = vmatpush2.bf16.msra.mxu0 %v2072_v31 }
  0xd5   : > { %781 = vmatprep.subr.bf16.mxu0 %v2073_v32 }
  0xd8   : > { %782 = vmatpush2.bf16.msra.mxu0 %v2075_v33 }
  0xdb   : > { %784 = vmatmul.mubr.bf16.vlgmr.msra.gmra.mxu0 %v2754_v34 }
 0x19b   : > { %v785_v41 = vpop.f32.mrf.mxu0 }
 0x19c   : > { %v786_v42 = vadd.f32 %v785_v41, %v577_v39 }
 0x19d   : > { %v787_v44 = vpop.f32.mrf.mxu0 }
 0x19e   : > { %799 = vrot.lane.b32.xlu1 %v786_v42, %s2379_s27  ;;  %793 = vrot.lane.b32.xlu0 %v786_v42, %s2380_s6  ;;  %v788_v46 = vadd.f32 %v787_v44, %v581_v43 }
 0x19f   : > { %v789_v45 = vpop.f32.mrf.mxu0 }
 0x1a1   : > { %v790_v47 = vpop.f32.mrf.mxu0 }
 0x1a2   : > { %803 = vrot.lane.b32.xlu1 %v788_v46, %s2380_s6  ;;  %796 = vrot.lane.b32.xlu0 %v786_v42, %s2381_s25 }
 0x1a6   : > { %809 = vrot.lane.b32.xlu1 %v788_v46, %s2379_s27  ;;  %806 = vrot.lane.b32.xlu0 %v788_v46, %s2381_s25 }
 0x210   : > { %v800_v56 = vpop.permute.xlu1 %799  ;;  %v794_v57 = vpop.permute.xlu0 %793 }
 0x211   : > { %v828_v0 = vcombine.low %v794_v57, %v800_v56  ;;  %v829_v4 = vcombine.high %v794_v57, %v800_v56 }
 0x213   : > { %v836_v8 = vrot.slane %v828_v0, %v819_v63  ;;  %v843_v15 = vrot.slane %v829_v4, %v819_v63 }
 0x214   : > { %v804_v61 = vpop.permute.xlu1 %803  ;;  %v797_v62 = vpop.permute.xlu0 %796 }
 0x215   : > { %v812_v1 = vcombine.low %v786_v42, %v797_v62  ;;  %v813_v2 = vcombine.high %v786_v42, %v797_v62 }
 0x217   : > { %v820_v5 = vrot.slane %v812_v1, %v819_v63  ;;  %v827_v9 = vrot.slane %v813_v2, %v819_v63 }
 0x218   : > { %v810_v6 = vpop.permute.xlu1 %809  ;;  %v807_v7 = vpop.permute.xlu0 %806 }
 0x219   : > { %v860_v10 = vcombine.low %v804_v61, %v810_v6  ;;  %v861_v11 = vcombine.high %v804_v61, %v810_v6  ;;  %v844_v12 = vcombine.low %v788_v46, %v807_v7  ;;  %v845_v13 = vcombine.high %v788_v46, %v807_v7 }
 0x21a   : > { %v876_v17 = vcombine.low %v820_v5, %v836_v8  ;;  %v877_v18 = vcombine.high %v820_v5, %v836_v8  ;;  %v892_v23 = vcombine.low %v827_v9, %v843_v15  ;;  %v893_v24 = vcombine.high %v827_v9, %v843_v15 }
 0x21b   : > { %v868_v19 = vrot.slane %v860_v10, %v819_v63  ;;  %v875_v20 = vrot.slane %v861_v11, %v819_v63  ;;  %v852_v21 = vrot.slane %v844_v12, %v819_v63  ;;  %v859_v22 = vrot.slane %v845_v13, %v819_v63 }
 0x21c   : > { %v884_v29 = vrot.slane %v876_v17, %v883_v14  ;;  %v891_v30 = vrot.slane %v877_v18, %v883_v14  ;;  %v900_v38 = vrot.slane %v892_v23, %v883_v14  ;;  %v907_v39 = vrot.slane %v893_v24, %v883_v14 }
 0x21d   : > { %v908_v25 = vcombine.low %v852_v21, %v868_v19  ;;  %v909_v26 = vcombine.high %v852_v21, %v868_v19  ;;  %v924_v27 = vcombine.low %v859_v22, %v875_v20  ;;  %v925_v28 = vcombine.high %v859_v22, %v875_v20 }
 0x21f   : > { %v916_v31 = vrot.slane %v908_v25, %v883_v14  ;;  %v923_v32 = vrot.slane %v909_v26, %v883_v14  ;;  %v932_v33 = vrot.slane %v924_v27, %v883_v14  ;;  %v939_v35 = vrot.slane %v925_v28, %v883_v14  ;;  %v1812_v26 = vld [vmem:[#allocation7] ss:$0 sm:$0xff] }
 0x221   : > { %v940_v41 = vcombine.low %v884_v29, %v916_v31  ;;  %v941_v42 = vcombine.high %v884_v29, %v916_v31  ;;  %v942_v43 = vcombine.low %v891_v30, %v923_v32  ;;  %v943_v44 = vcombine.high %v891_v30, %v923_v32 }
 0x222   : > { %v944_v45 = vcombine.low %v900_v38, %v932_v33  ;;  %v945_v46 = vcombine.high %v900_v38, %v932_v33  ;;  %v946_v47 = vcombine.low %v907_v39, %v939_v35  ;;  %v947_v48 = vcombine.high %v907_v39, %v939_v35 }
 0x223   : > { %v949_v49 = vsel %vm948_vm0, %v940_v41, -inf  ;;  %v956_v50 = vsel %vm948_vm0, %v941_v42, -inf  ;;  %v963_v51 = vsel %vm948_vm0, %v942_v43, -inf  ;;  %v970_v52 = vsel %vm948_vm0, %v943_v44, -inf }
 0x224   : > { %v950_v53 = vrot.slane %v949_v49, 4  ;;  %v957_v54 = vrot.slane %v956_v50, 4  ;;  %v964_v55 = vrot.slane %v963_v51, 4  ;;  %v971_v56 = vrot.slane %v970_v52, 4 }
 0x225   : > { %v977_v57 = vsel %vm948_vm0, %v944_v45, -inf  ;;  %v984_v58 = vsel %vm948_vm0, %v945_v46, -inf  ;;  %v991_v59 = vsel %vm948_vm0, %v946_v47, -inf  ;;  %v998_v60 = vsel %vm948_vm0, %v947_v48, -inf }
 0x226   : > { %v951_v61 = vmax.f32 %v949_v49, %v950_v53  ;;  %v958_v62 = vmax.f32 %v956_v50, %v957_v54  ;;  %v965_v63 = vmax.f32 %v963_v51, %v964_v55  ;;  %v972_v0 = vmax.f32 %v970_v52, %v971_v56 }
 0x227   : > { %v978_v1 = vrot.slane %v977_v57, 4  ;;  %v985_v2 = vrot.slane %v984_v58, 4  ;;  %v992_v3 = vrot.slane %v991_v59, 4  ;;  %v999_v4 = vrot.slane %v998_v60, 4 }
 0x228   : > { %v952_v5 = vrot.slane %v951_v61, 2  ;;  %v959_v6 = vrot.slane %v958_v62, 2  ;;  %v966_v7 = vrot.slane %v965_v63, 2  ;;  %v973_v8 = vrot.slane %v972_v0, 2 }
 0x229   : > { %v979_v9 = vmax.f32 %v977_v57, %v978_v1  ;;  %v986_v10 = vmax.f32 %v984_v58, %v985_v2  ;;  %v993_v11 = vmax.f32 %v991_v59, %v992_v3  ;;  %v1000_v12 = vmax.f32 %v998_v60, %v999_v4 }
 0x22a   : > { %v953_v13 = vmax.f32 %v951_v61, %v952_v5  ;;  %v960_v14 = vmax.f32 %v958_v62, %v959_v6  ;;  %v967_v15 = vmax.f32 %v965_v63, %v966_v7  ;;  %v974_v17 = vmax.f32 %v972_v0, %v973_v8 }
 0x22b   : > { %v980_v18 = vrot.slane %v979_v9, 2  ;;  %v987_v19 = vrot.slane %v986_v10, 2  ;;  %v994_v20 = vrot.slane %v993_v11, 2  ;;  %v1001_v21 = vrot.slane %v1000_v12, 2 }
 0x22c   : > { %v954_v22 = vrot.slane %v953_v13, 1  ;;  %v961_v23 = vrot.slane %v960_v14, 1  ;;  %v968_v24 = vrot.slane %v967_v15, 1  ;;  %v975_v25 = vrot.slane %v974_v17, 1 }
 0x22d   : > { %v981_v27 = vmax.f32 %v979_v9, %v980_v18  ;;  %v988_v28 = vmax.f32 %v986_v10, %v987_v19  ;;  %v995_v29 = vmax.f32 %v993_v11, %v994_v20  ;;  %v1002_v30 = vmax.f32 %v1000_v12, %v1001_v21 }
 0x22e   : > { %v955_v31 = vmax.f32 %v953_v13, %v954_v22  ;;  %v962_v32 = vmax.f32 %v960_v14, %v961_v23  ;;  %v969_v33 = vmax.f32 %v967_v15, %v968_v24  ;;  %v976_v35 = vmax.f32 %v974_v17, %v975_v25 }
 0x22f   : > { %v982_v38 = vrot.slane %v981_v27, 1  ;;  %v989_v39 = vrot.slane %v988_v28, 1  ;;  %v996_v41 = vrot.slane %v995_v29, 1  ;;  %v1003_v42 = vrot.slane %v1002_v30, 1 }
 0x230   : > { %v1012_v43 = vadd.f32 %v1812_v26, %v955_v31  ;;  %v1013_v44 = vadd.f32 %v1812_v26, %v962_v32  ;;  %v1014_v45 = vadd.f32 %v1812_v26, %v969_v33  ;;  %v1015_v46 = vadd.f32 %v1812_v26, %v976_v35  ;;  %v2089_v32 = vld [vmem:[#allocation9 + $0x64] ss:$8 sps:$4 sm:$0xff]   ;;  %v2087_v33 = vld [vmem:[#allocation9 + $0x60] ss:$8 sps:$4 sm:$0xff]   ;;  %v2092_v35 = vld [vmem:[#allocation9 + $0x54] ss:$8 sps:$4 sm:$0xff]  }
 0x231   : > { %v983_v47 = vmax.f32 %v981_v27, %v982_v38  ;;  %v990_v48 = vmax.f32 %v988_v28, %v989_v39  ;;  %v997_v49 = vmax.f32 %v995_v29, %v996_v41  ;;  %v1004_v50 = vmax.f32 %v1002_v30, %v1003_v42  ;;  %v2084_v29 = vld [vmem:[#allocation9 + $0x70] ss:$8 sps:$4 sm:$0xff]   ;;  %v2095_v39 = vld [vmem:[#allocation9 + $0x44] ss:$8 sps:$4 sm:$0xff]   ;;  %v2093_v41 = vld [vmem:[#allocation9 + $0x40] ss:$8 sps:$4 sm:$0xff]  }
 0x232   : > { %v1020_v51 = vmax.f32 %v1012_v43, 0.0  ;;  %v1021_v52 = vmax.f32 %v1013_v44, 0.0  ;;  %v1022_v53 = vmax.f32 %v1014_v45, 0.0  ;;  %v1023_v54 = vmax.f32 %v1015_v46, 0.0  ;;  %v2090_v38 = vld [vmem:[#allocation9 + $0x50] ss:$8 sps:$4 sm:$0xff]  }
 0x233   : > { %v1016_v55 = vadd.f32 %v1812_v26, %v983_v47  ;;  %v1017_v56 = vadd.f32 %v1812_v26, %v990_v48  ;;  %v1018_v57 = vadd.f32 %v1812_v26, %v997_v49  ;;  %v1019_v58 = vadd.f32 %v1812_v26, %v1004_v50  ;;  %v2098_v42 = vld [vmem:[#allocation9 + $0x34] ss:$8 sps:$4 sm:$0xff]   ;;  %v2096_v43 = vld [vmem:[#allocation9 + $0x30] ss:$8 sps:$4 sm:$0xff]   ;;  %v2101_v44 = vld [vmem:[#allocation9 + $0x24] ss:$8 sps:$4 sm:$0xff]  }
 0x234   : > { %v1060_v59 = vpack.c.bf16 %v1020_v51, %v1020_v51  ;;  %v1061_v60 = vpack.c.bf16 %v1021_v52, %v1021_v52  ;;  %v1062_v61 = vpack.c.bf16 %v1022_v53, %v1022_v53  ;;  %v1063_v62 = vpack.c.bf16 %v1023_v54, %v1023_v54  ;;  %v2099_v45 = vld [vmem:[#allocation9 + $0x20] ss:$8 sps:$4 sm:$0xff]   ;;  %v2104_v46 = vld [vmem:[#allocation9 + $0x14] ss:$8 sps:$4 sm:$0xff]   ;;  %v2107_v47 = vld [vmem:[#allocation9 + $0x4] ss:$8 sps:$4 sm:$0xff]  }
 0x235   : > { %v1024_v63 = vmax.f32 %v1016_v55, 0.0  ;;  %v1025_v0 = vmax.f32 %v1017_v56, 0.0  ;;  %v1026_v1 = vmax.f32 %v1018_v57, 0.0  ;;  %v1027_v2 = vmax.f32 %v1019_v58, 0.0  ;;  %v2105_v48 = vld [vmem:[#allocation9] ss:$8 sps:$4 sm:$0xff]  }
 0x236   : > { %v1081_v3 = vunpack.c.l.b16 %v1061_v60  ;;  %v1082_v4 = vunpack.c.l.b16 %v1062_v61  ;;  %v1083_v5 = vunpack.c.l.b16 %v1063_v62  ;;  %v1080_v10 = vunpack.c.l.b16 %v1060_v59  ;;  %v2110_v49 = vld [vmem:[#allocation9 + $0xf4] ss:$8 sps:$4 sm:$0xff]   ;;  %v2108_v50 = vld [vmem:[#allocation9 + $0xf0] ss:$8 sps:$4 sm:$0xff]   ;;  %v2113_v51 = vld [vmem:[#allocation9 + $0xe4] ss:$8 sps:$4 sm:$0xff]  }
 0x237   : > { %v1064_v6 = vpack.c.bf16 %v1024_v63, %v1024_v63  ;;  %v1065_v7 = vpack.c.bf16 %v1025_v0, %v1025_v0  ;;  %v1066_v8 = vpack.c.bf16 %v1026_v1, %v1026_v1  ;;  %v1067_v9 = vpack.c.bf16 %v1027_v2, %v1027_v2  ;;  %v2111_v52 = vld [vmem:[#allocation9 + $0xe0] ss:$8 sps:$4 sm:$0xff]   ;;  %v2116_v53 = vld [vmem:[#allocation9 + $0xd4] ss:$8 sps:$4 sm:$0xff]   ;;  %v2114_v54 = vld [vmem:[#allocation9 + $0xd0] ss:$8 sps:$4 sm:$0xff]  }
 0x238   : > { %v1088_v11 = vrot.slane %v1081_v3, 7  ;;  %v1091_v12 = vrot.slane %v1082_v4, 6  ;;  %v1094_v17 = vrot.slane %v1083_v5, 5  ;;  %v2119_v55 = vld [vmem:[#allocation9 + $0xc4] ss:$8 sps:$4 sm:$0xff]   ;;  %v1426_v1 = vld [vmem:[%s2912_s9 + $0xf8] sm:$0xff] }
 0x239   : > { %v1084_v13 = vunpack.c.l.b16 %v1064_v6  ;;  %v1085_v14 = vunpack.c.l.b16 %v1065_v7  ;;  %v1086_v15 = vunpack.c.l.b16 %v1066_v8  ;;  %v1087_v18 = vunpack.c.l.b16 %v1067_v9  ;;  %v2117_v56 = vld [vmem:[#allocation9 + $0xc0] ss:$8 sps:$4 sm:$0xff]   ;;  %v2122_v57 = vld [vmem:[#allocation9 + $0xb4] ss:$8 sps:$4 sm:$0xff]   ;;  %v2120_v58 = vld [vmem:[#allocation9 + $0xb0] ss:$8 sps:$4 sm:$0xff]   ;;  %1855 = vmatprep.subr.mxu0 %v1426_v1 }
 0x23a   : > { %v1090_v19 = vsel %vm1089_vm1, %v1088_v11, %v1080_v10  ;;  %v2125_v59 = vld [vmem:[#allocation9 + $0xa4] ss:$8 sps:$4 sm:$0xff]   ;;  %v2123_v60 = vld [vmem:[#allocation9 + $0xa0] ss:$8 sps:$4 sm:$0xff]   ;;  %v2128_v61 = vld [vmem:[#allocation9 + $0x94] ss:$8 sps:$4 sm:$0xff]  }
 0x23b   : > { %v1093_v20 = vsel %vm1092_vm2, %v1091_v12, %v1090_v19  ;;  %v1097_v21 = vrot.slane %v1084_v13, 4  ;;  %v1100_v23 = vrot.slane %v1085_v14, 3  ;;  %v1103_v25 = vrot.slane %v1086_v15, 2  ;;  %v2126_v62 = vld [vmem:[#allocation9 + $0x90] ss:$8 sps:$4 sm:$0xff]   ;;  %v1408_v5 = vld [vmem:[%s2912_s9 + $0x68] sm:$0xff] }
 0x23c   : > { %v1096_v22 = vsel %vm1095_vm3, %v1094_v17, %v1093_v20  ;;  %v1106_v27 = vrot.slane %v1087_v18, 1  ;;  %v2131_v63 = vld [vmem:[#allocation9 + $0x84] ss:$8 sps:$4 sm:$0xff]   ;;  %v2129_v0 = vld [vmem:[#allocation9 + $0x80] ss:$8 sps:$4 sm:$0xff]   ;;  %v1410_v2 = vld [vmem:[%s2912_s9 + $0x78] sm:$0xff] }
 0x23d   : > { %v1099_v24 = vsel %vm1098_vm4, %v1097_v21, %v1096_v22  ;;  %v1425_v3 = vld [vmem:[%s2912_s9 + $0xf0] sm:$0xff]  ;;  %1856 = vmatpush3.msra.mxu0 %v1410_v2  ;;  %v1423_v6 = vld [vmem:[%s2912_s9 + $0xe0] sm:$0xff]  ;;  %v1422_v8 = vld [vmem:[%s2912_s9 + $0xd8] sm:$0xff] }
 0x23e   : > { %v1102_v26 = vsel %vm1101_vm5, %v1100_v23, %v1099_v24  ;;  %v1409_v4 = vld [vmem:[%s2912_s9 + $0x70] sm:$0xff]  ;;  %1857 = vmatprep.subr.mxu0 %v1425_v3  ;;  %v1407_v7 = vld [vmem:[%s2912_s9 + $0x60] sm:$0xff]  ;;  %v1406_v9 = vld [vmem:[%s2912_s9 + $0x58] sm:$0xff] }
 0x23f   : > { %v1105_v28 = vsel %vm1104_vm6, %v1103_v25, %v1102_v26  ;;  %1858 = vmatpush3.msra.mxu0 %v1409_v4  ;;  %v1421_v10 = vld [vmem:[%s2912_s9 + $0xd0] sm:$0xff]  ;;  %v1420_v12 = vld [vmem:[%s2912_s9 + $0xc8] sm:$0xff]  ;;  %v1419_v14 = vld [vmem:[%s2912_s9 + $0xc0] sm:$0xff] }
 0x240   : > { %v1108_v30 = vsel %vm1107_vm7, %v1106_v27, %v1105_v28  ;;  %v1405_v11 = vld [vmem:[%s2912_s9 + $0x50] sm:$0xff]  ;;  %v1404_v13 = vld [vmem:[%s2912_s9 + $0x48] sm:$0xff]  ;;  %v1403_v15 = vld [vmem:[%s2912_s9 + $0x40] sm:$0xff] }
 0x241   : > { %v1109_v31 = vpack.c.b16 %v1108_v30, %v1108_v30  ;;  %v1418_v17 = vld [vmem:[%s2912_s9 + $0xb8] sm:$0xff]  ;;  %v1417_v19 = vld [vmem:[%s2912_s9 + $0xb0] sm:$0xff]  ;;  %v1416_v21 = vld [vmem:[%s2912_s9 + $0xa8] sm:$0xff] }
 0x242   : > { %v1402_v18 = vld [vmem:[%s2912_s9 + $0x38] sm:$0xff]  ;;  %v1401_v20 = vld [vmem:[%s2912_s9 + $0x30] sm:$0xff]  ;;  %v1400_v22 = vld [vmem:[%s2912_s9 + $0x28] sm:$0xff] }
 0x243   : > { %1817 = vmatmul.mubr.msk.bf16.vlgmr.msra.gmra.mxu1 %vm948_vm0, %v1109_v31  ;;  %v1415_v23 = vld [vmem:[%s2912_s9 + $0xa0] sm:$0xff]  ;;  %v1414_v25 = vld [vmem:[%s2912_s9 + $0x98] sm:$0xff]  ;;  %v1413_v27 = vld [vmem:[%s2912_s9 + $0x90] sm:$0xff] }
 0x244   : > { %1335 = vmatpush1.bf16.msra.mxu1 %v2084_v29  ;;  %1366 = vmatprep.mubr.bf16.mxu1 %v2700_v16  ;;  %v2102_v16 = vld [vmem:[#allocation9 + $0x10] ss:$8 sps:$4 sm:$0xff]   ;;  %v1399_v24 = vld [vmem:[%s2912_s9 + $0x20] sm:$0xff]  ;;  %v1412_v29 = vld [vmem:[%s2912_s9 + $0x88] sm:$0xff] }
 0x245   : > { %1336 = vmatprep.subr.bf16.mxu1 %v2089_v32  ;;  %v1398_v26 = vld [vmem:[%s2912_s9 + $0x18] sm:$0xff]  ;;  %v1397_v28 = vld [vmem:[%s2912_s9 + $0x10] sm:$0xff]  ;;  %v1396_v30 = vld [vmem:[%s2912_s9 + $0x8] sm:$0xff] }
 0x246   : > { %v1411_v31 = vld [vmem:[%s2912_s9 + $0x80] sm:$0xff] }
 0x247   : > { %v1395_v32 = vld [vmem:[%s2912_s9] sm:$0xff] }
 0x248   : > { %1337 = vmatpush1.bf16.msra.mxu1 %v2087_v33 }
 0x249   : > { %1338 = vmatprep.subr.bf16.mxu1 %v2092_v35 }
 0x24c   : > { %1339 = vmatpush1.bf16.msra.mxu1 %v2090_v38 }
 0x24d   : > { %1340 = vmatprep.subr.bf16.mxu1 %v2095_v39 }
 0x250   : > { %1341 = vmatpush1.bf16.msra.mxu1 %v2093_v41  ;;  %v1375_v41 = vld [vmem:[#allocation12] sm:$0x3] }
 0x251   : > { %1342 = vmatprep.subr.bf16.mxu1 %v2098_v42 }
 0x254   : > { %1343 = vmatpush1.bf16.msra.mxu1 %v2096_v43  ;;  %v1380_v43 = vrot.slane %v1375_v41, %v576_v37 }
 0x255   : > { %1344 = vmatprep.subr.bf16.mxu1 %v2101_v44 }
 0x258   : > { %1345 = vmatpush1.bf16.msra.mxu1 %v2099_v45  ;;  %v1389_v45 = vld [vmem:[%s444_s17] sm:$0xff] }
 0x259   : > { %1346 = vmatprep.subr.bf16.mxu1 %v2104_v46  ;;  %v1392_v46 = vld [vmem:[%s453_s24] sm:$0xff]  ;;  %s533_s24 = scalar_lea.vmem %s2913_s10, %s2679_s16 }
 0x25c   : > { %1347 = vmatpush1.bf16.msra.mxu1 %v2102_v16  ;;  %v1384_v16 = vrot.slane %v1375_v41, %v580_v40 }
 0x25d   : > { %1348 = vmatprep.subr.bf16.mxu1 %v2107_v47 }
 0x260   : > { %1349 = vmatpush1.bf16.msra.mxu1 %v2105_v48 }
 0x261   : > { %1350 = vmatprep.subr.bf16.mxu1 %v2110_v49  ;;  %v1391_v49 = vunpack.c.h.bf16 %v1389_v45 }
 0x264   : > { %1351 = vmatpush2.bf16.msra.mxu1 %v2108_v50  ;;  %v1394_v50 = vunpack.c.h.bf16 %v1392_v46 }
 0x265   : > { %1352 = vmatprep.subr.bf16.mxu1 %v2113_v51 }
 0x268   : > { %1353 = vmatpush2.bf16.msra.mxu1 %v2111_v52  ;;  %v1390_v52 = vunpack.c.l.bf16 %v1389_v45 }
 0x269   : > { %1354 = vmatprep.subr.bf16.mxu1 %v2116_v53  ;;  %v1393_v53 = vunpack.c.l.bf16 %v1392_v46 }
 0x26c   : > { %1355 = vmatpush2.bf16.msra.mxu1 %v2114_v54 }
 0x26d   : > { %1356 = vmatprep.subr.bf16.mxu1 %v2119_v55 }
 0x270   : > { %1357 = vmatpush2.bf16.msra.mxu1 %v2117_v56 }
 0x271   : > { %1358 = vmatprep.subr.bf16.mxu1 %v2122_v57 }
 0x274   : > { %1359 = vmatpush2.bf16.msra.mxu1 %v2120_v58 }
 0x275   : > { %1360 = vmatprep.subr.bf16.mxu1 %v2125_v59 }
 0x278   : > { %1361 = vmatpush2.bf16.msra.mxu1 %v2123_v60 }
 0x279   : > { %1362 = vmatprep.subr.bf16.mxu1 %v2128_v61 }
 0x27c   : > { %1363 = vmatpush2.bf16.msra.mxu1 %v2126_v62 }
 0x27d   : > { %1364 = vmatprep.subr.bf16.mxu1 %v2131_v63 }
 0x280   : > { %1365 = vmatpush2.bf16.msra.mxu1 %v2129_v0 }
 0x281   : > { %1890 = vmatprep.subr.mxu1 %v1426_v1 }
 0x283   : > { %1367 = vmatmul.mubr.bf16.vlgmr.msra.gmra.mxu1 %v2754_v34  ;;  %v1424_v34 = vld [vmem:[%s2912_s9 + $0xe8] sm:$0xff] }
 0x284   : > { %1891 = vmatpush3.msra.mxu1 %v1410_v2  ;;  %1859 = vmatprep.subr.mxu0 %v1424_v34 }
 0x285   : > { %1892 = vmatprep.subr.mxu1 %v1425_v3  ;;  %1860 = vmatpush3.msra.mxu0 %v1408_v5 }
 0x286   : > { %1893 = vmatpush3.msra.mxu1 %v1409_v4  ;;  %1861 = vmatprep.subr.mxu0 %v1423_v6 }
 0x287   : > { %1894 = vmatprep.subr.mxu1 %v1424_v34  ;;  %1862 = vmatpush3.msra.mxu0 %v1407_v7 }
 0x288   : > { %1895 = vmatpush3.msra.mxu1 %v1408_v5  ;;  %1863 = vmatprep.subr.mxu0 %v1422_v8 }
 0x289   : > { %1896 = vmatprep.subr.mxu1 %v1423_v6  ;;  %1864 = vmatpush3.msra.mxu0 %v1406_v9 }
 0x28a   : > { %1897 = vmatpush3.msra.mxu1 %v1407_v7  ;;  %1865 = vmatprep.subr.mxu0 %v1421_v10 }
 0x28b   : > { %1898 = vmatprep.subr.mxu1 %v1422_v8  ;;  %1866 = vmatpush3.msra.mxu0 %v1405_v11 }
 0x28c   : > { %1899 = vmatpush3.msra.mxu1 %v1406_v9  ;;  %1867 = vmatprep.subr.mxu0 %v1420_v12 }
 0x28d   : > { %1900 = vmatprep.subr.mxu1 %v1421_v10  ;;  %1868 = vmatpush3.msra.mxu0 %v1404_v13 }
 0x28e   : > { %1901 = vmatpush3.msra.mxu1 %v1405_v11  ;;  %1869 = vmatprep.subr.mxu0 %v1419_v14 }
 0x28f   : > { %1902 = vmatprep.subr.mxu1 %v1420_v12  ;;  %1870 = vmatpush3.msra.mxu0 %v1403_v15 }
 0x290   : > { %1903 = vmatpush3.msra.mxu1 %v1404_v13  ;;  %1871 = vmatprep.subr.mxu0 %v1418_v17 }
 0x291   : > { %1904 = vmatprep.subr.mxu1 %v1419_v14  ;;  %1872 = vmatpush3.msra.mxu0 %v1402_v18 }
 0x292   : > { %1905 = vmatpush3.msra.mxu1 %v1403_v15  ;;  %1873 = vmatprep.subr.mxu0 %v1417_v19 }
 0x293   : > { %1906 = vmatprep.subr.mxu1 %v1418_v17  ;;  %1874 = vmatpush3.msra.mxu0 %v1401_v20 }
 0x294   : > { %1907 = vmatpush3.msra.mxu1 %v1402_v18  ;;  %1875 = vmatprep.subr.mxu0 %v1416_v21 }
 0x295   : > { %1908 = vmatprep.subr.mxu1 %v1417_v19  ;;  %1876 = vmatpush3.msra.mxu0 %v1400_v22 }
 0x296   : > { %1909 = vmatpush3.msra.mxu1 %v1401_v20  ;;  %1877 = vmatprep.subr.mxu0 %v1415_v23 }
 0x297   : > { %1910 = vmatprep.subr.mxu1 %v1416_v21  ;;  %1878 = vmatpush3.msra.mxu0 %v1399_v24 }
 0x298   : > { %1911 = vmatpush3.msra.mxu1 %v1400_v22  ;;  %1879 = vmatprep.subr.mxu0 %v1414_v25 }
 0x299   : > { %1912 = vmatprep.subr.mxu1 %v1415_v23  ;;  %1880 = vmatpush3.msra.mxu0 %v1398_v26 }
 0x29a   : > { %1913 = vmatpush3.msra.mxu1 %v1399_v24  ;;  %1881 = vmatprep.subr.mxu0 %v1413_v27 }
 0x29b   : > { %1914 = vmatprep.subr.mxu1 %v1414_v25  ;;  %1882 = vmatpush3.msra.mxu0 %v1397_v28 }
 0x29c   : > { %1915 = vmatpush3.msra.mxu1 %v1398_v26  ;;  %1883 = vmatprep.subr.mxu0 %v1412_v29 }
 0x29d   : > { %1916 = vmatprep.subr.mxu1 %v1413_v27  ;;  %1884 = vmatpush3.msra.mxu0 %v1396_v30 }
 0x29e   : > { %1917 = vmatpush3.msra.mxu1 %v1397_v28  ;;  %1885 = vmatprep.subr.mxu0 %v1411_v31 }
 0x29f   : > { %1918 = vmatprep.subr.mxu1 %v1412_v29  ;;  %1886 = vmatpush3.msra.mxu0 %v1395_v32 }
 0x2a0   : > { %1919 = vmatpush3.msra.mxu1 %v1396_v30 }
 0x2a1   : > { %1920 = vmatprep.subr.mxu1 %v1411_v31 }
 0x2a2   : > { %1921 = vmatpush3.msra.mxu1 %v1395_v32 }
 0x303   : > { %v1167_v33 = vpop.f32.mrf.mxu1 }
 0x305   : > { %v1169_v35 = vpop.f32.mrf.mxu1 }
 0x307   : > { %v1171_v38 = vpop.f32.mrf.mxu1 }
 0x309   : > { %v1172_v39 = vpop.f32.mrf.mxu1 }
 0x343   : > { %v1368_v42 = vpop.f32.mrf.mxu1 }
 0x344   : > { %v1369_v44 = vadd.f32 %v1368_v42, %v1167_v33 }
 0x345   : > { %v1370_v47 = vpop.f32.mrf.mxu1 }
 0x346   : > { %v1371_v48 = vadd.f32 %v1370_v47, %v1169_v35  ;;  %v1387_v51 = vadd.f32 %v1380_v43, %v1369_v44 }
 0x347   : > { %v1372_v54 = vpop.f32.mrf.mxu1 }
 0x348   : > { %v1388_v55 = vadd.f32 %v1384_v16, %v1371_v48  ;;  %v1427_v58 = vmul.f32 %v1390_v52, %v1387_v51  ;;  %v1501_v59 = vmul.f32 %v1393_v53, %v1387_v51 }
 0x349   : > { %v1373_v37 = vpop.f32.mrf.mxu1 }
 0x34a   : > { %v1428_v56 = vmul.f32 %v1391_v49, %v1388_v55  ;;  %v1502_v57 = vmul.f32 %v1394_v50, %v1388_v55 }
 0x34c   : > { %1493 = vmatprep.mubr.f32.mxu0 %v1428_v56  ;;  %1567 = vmatprep.mubr.f32.mxu1 %v1502_v57 }
 0x34d   : > { %1494 = vmatmul.mubr.f32.vlgmr.msra.gmra.mxu0 %v1427_v58  ;;  %1568 = vmatmul.mubr.f32.vlgmr.msra.gmra.mxu1 %v1501_v59 }
 0x40d   : > { %v1887_v36 = vpop.f32.mrf.mxu0  ;;  %v1922_v40 = vpop.f32.mrf.mxu1 }
 0x40f   : > { %v1888_v60 = vpop.f32.mrf.mxu0  ;;  %v1923_v61 = vpop.f32.mrf.mxu1 }
 0x410   : > { %v1889_v62 = vadd.f32 %v1888_v60, %v1887_v36  ;;  %v1924_v63 = vadd.f32 %v1923_v61, %v1922_v40 }
 0x412   : > { %1500 = vst.msk [vmem:[%s533_s24] sm:$0xff] %vm1499_vm8, %v1889_v62  ;;  %1573 = vst.msk [vmem:[%s537_s21] sm:$0xff] %vm1499_vm8, %v1924_v63 }
 0x413 PF: > { %p27_p13 = scmp.ge.s32.totalorder %s2532_s30, 4   ;;  %s2942_s17 = smov %s2360_s18 }
 0x414   : > { %s2943_s18 = smov %s2364_s19  ;;  %s2944_s19 = smov %s2543_s12 }
 0x415   : > { %s2945_s20 = smov %s2532_s30  ;;  %29 = sbr.rel (!%p27_p13) target bundleno = 13 (0xd), region = 148 }
 0x41a   :  { %1607 = vsyncpa [#allocation3], 1 }
 0x41b   :  { %1609 = vsyncpa [#allocation3 + $0x1], 1 }
 0x41c   :  { %1610 = vsyncpa [#allocation5], 1 }
 0x41d   :  { %1612 = vsyncpa [#allocation5 + $0x1], 1 }
 0x41e   :  { %1613 = vsyncpa [#allocation8], 1 }
 0x41f   :  { %1614 = vsyncpa [#allocation11], 1 }

</bundles_post_ra>
